<compile_context>
chip_gen: v7x
topology: tpu7x:2x2x1
jax: 0.10.0
libtpu: 0.0.40
codegen_flags: <defaults>
</compile_context>

<pallas_src>
import jax
import jax.numpy as jnp
from jax.experimental import pallas as pl
from jax.experimental.pallas import tpu as pltpu


_LANE = 128    # vreg lane width (last dim)
_SUBLANE = 8   # f32 sublane tile (second-to-last dim)


def _round_up(n, m):
    return ((n + m - 1) // m) * m


def _pad2(a, rows, cols):
    pr, pc = rows - a.shape[0], cols - a.shape[1]
    if pr == 0 and pc == 0:
        return a
    return jnp.pad(a, ((0, pr), (0, pc)))


def fcnn_aggregator_kernel(alpha_ref, x_ref, w1_ref, b1_ref, w2_ref, b2_ref, o_ref):
    """Fused: (x @ W1 + b1) -> PReLU -> (@ W2 + b2) -> PReLU (shared alpha)."""
    a = alpha_ref[0, 0]  # scalar PReLU slope (num_parameters=1, shared)

    # fc1: MXU takes the input dtype directly, accumulates in f32.
    h = jnp.dot(x_ref[...], w1_ref[...], preferred_element_type=jnp.float32)
    h = h + b1_ref[...]
    h = jnp.where(h > 0.0, h, a * h)              # PReLU

    # fc2: keep the f32 accumulator; upcast weights if they are narrower so we
    # never silently downcast the hidden activation.
    y = jnp.dot(h, w2_ref[...].astype(jnp.float32),
                preferred_element_type=jnp.float32)
    y = y + b2_ref[...]
    y = jnp.where(y > 0.0, y, a * y)              # PReLU (same alpha)

    o_ref[...] = y.astype(o_ref.dtype)


def fcnn_aggregator(x, w1, b1, w2, b2, alpha, *, block_b=8192, out_dtype=None):
    """Fused FCNNAggregator forward.

    x:     (B, input_dim)
    w1:    (input_dim, hidden)     b1: (1, hidden)     [hidden = output_dim // 2]
    w2:    (hidden, output_dim)    b2: (1, output_dim)
    alpha: scalar PReLU slope (any shape with one element)

    Weights are stored (in_features, out_features), i.e. PyTorch's W.T, so the
    kernel computes y = x @ W + b.
    """
    B, d_in = x.shape
    hidden = w1.shape[1]
    d_out = w2.shape[1]
    assert w1.shape[0] == d_in and w2.shape[0] == hidden
    if out_dtype is None:
        out_dtype = x.dtype

    # Only the hidden (intermediate) dim gets lane padding; it never touches
    # HBM activation traffic and keeps both matmuls lane-aligned.
    hid_p = _round_up(hidden, _LANE)

    x_bytes = jnp.dtype(x.dtype).itemsize
    o_bytes = jnp.dtype(out_dtype).itemsize
    w_bytes = jnp.dtype(w1.dtype).itemsize

    # ---- VMEM budget: double-buffered x/out tiles + double-buffered
    # weights/biases + f32 intermediates (h, y).  Budget 16 MiB of working set
    # and explicitly raise the scoped-VMEM limit to 32 MiB (safe on every
    # generation: v7x has 64 MiB physical per TC, v5e/v6e have 128 MiB).
    fixed_bytes = 2 * w_bytes * (d_in * hid_p + hid_p * d_out + hid_p + d_out)
    per_row_bytes = (2 * d_in * x_bytes          # x tile, double-buffered
                     + 2 * d_out * o_bytes       # out tile, double-buffered
                     + 4 * (hid_p + d_out))      # f32 intermediates h, y
    vmem_budget = 16 * 1024 * 1024
    max_rows = max(_SUBLANE,
                   ((vmem_budget - fixed_bytes) // per_row_bytes)
                   // _SUBLANE * _SUBLANE)
    block_b = max(1, min(block_b, max_rows))

    if B <= block_b:
        block_b = B                                  # single full-extent block
    else:
        block_b = max(_SUBLANE, (block_b // _SUBLANE) * _SUBLANE)
    grid_b = pl.cdiv(B, block_b)                     # edge block masked by Pallas

    # ---- One-time padding of the tiny weight/bias tensors only (exact:
    # PReLU(0) == 0 and zero rows of w2 contribute nothing).
    w1_p = _pad2(w1, d_in, hid_p)
    b1_p = _pad2(b1.reshape(1, hidden), 1, hid_p)
    w2_p = _pad2(w2, hid_p, d_out)
    b2_p = b2.reshape(1, d_out)
    alpha_p = jnp.asarray(alpha, jnp.float32).reshape(1, 1)

    # ---- Honest (unpadded) advisory cost estimate.
    flops = 2 * B * (d_in * hidden + hidden * d_out)
    bytes_accessed = (B * d_in * x_bytes + B * d_out * o_bytes
                      + w_bytes * (d_in * hidden + hidden * d_out
                                   + hidden + d_out))
    cost = pl.CostEstimate(flops=flops, transcendentals=0,
                           bytes_accessed=bytes_accessed)

    return pl.pallas_call(
        fcnn_aggregator_kernel,
        out_shape=jax.ShapeDtypeStruct((B, d_out), out_dtype),
        grid=(grid_b,),
        in_specs=[
            # PReLU alpha: tiny scalar in SMEM
            pl.BlockSpec((1, 1), lambda i: (0, 0),
                         memory_space=pltpu.MemorySpace.SMEM),
            # activations: streamed unpadded, tiled over batch
            pl.BlockSpec((block_b, d_in), lambda i: (i, 0)),
            # weights / biases: constant block index -> fetched once, resident
            pl.BlockSpec((d_in, hid_p), lambda i: (0, 0)),
            pl.BlockSpec((1, hid_p), lambda i: (0, 0)),
            pl.BlockSpec((hid_p, d_out), lambda i: (0, 0)),
            pl.BlockSpec((1, d_out), lambda i: (0, 0)),
        ],
        out_specs=pl.BlockSpec((block_b, d_out), lambda i: (i, 0)),
        compiler_params=pltpu.CompilerParams(
            dimension_semantics=("parallel",),
            vmem_limit_bytes=32 * 1024 * 1024),
        cost_estimate=cost,
    )(alpha_p, x_p := x, w1_p, b1_p, w2_p, b2_p)


def reference_forward(x, w1, b1, w2, b2, alpha):
    """Pure-JAX reference mirroring the PyTorch module."""
    a = jnp.asarray(alpha, jnp.float32).reshape(())
    h = x @ w1 + b1
    h = jnp.where(h > 0, h, a * h)
    y = h @ w2 + b2
    y = jnp.where(y > 0, y, a * y)
    return y


if __name__ == "__main__":
    # Small shapes consistent with the module: input_dim=32, output_dim=64
    B = 8
    input_dim = 32
    output_dim = 64
    hidden = output_dim // 2  # fc1 output

    key = jax.random.PRNGKey(0)
    k_x, k_w1, k_b1, k_w2, k_b2 = jax.random.split(key, 5)

    # Deterministic parameter init (PyTorch-Linear-style uniform bounds).
    bound1 = 1.0 / (input_dim ** 0.5)
    bound2 = 1.0 / (hidden ** 0.5)
    # Stored as (in, out): equivalent to PyTorch's W_pt.T
    w1 = jax.random.uniform(k_w1, (input_dim, hidden), jnp.float32, -bound1, bound1)
    b1 = jax.random.uniform(k_b1, (1, hidden), jnp.float32, -bound1, bound1)
    w2 = jax.random.uniform(k_w2, (hidden, output_dim), jnp.float32, -bound2, bound2)
    b2 = jax.random.uniform(k_b2, (1, output_dim), jnp.float32, -bound2, bound2)
    # nn.PReLU() default: single parameter initialized to 0.25
    alpha = jnp.full((1, 1), 0.25, dtype=jnp.float32)

    x = jax.random.normal(k_x, (B, input_dim), dtype=jnp.float32)

    out = fcnn_aggregator(x, w1, b1, w2, b2, alpha)
    out = jax.block_until_ready(out)

    ref = reference_forward(x, w1, b1, w2, b2, alpha)
    assert out.shape == (B, output_dim)
    assert jnp.allclose(out, ref, atol=1e-5, rtol=1e-5), "mismatch vs reference"

    # Also exercise a ragged batch (partial last block) to validate the
    # no-padding edge-block path.
    B2 = 1003
    x2 = jax.random.normal(jax.random.PRNGKey(1), (B2, input_dim), jnp.float32)
    out2 = jax.block_until_ready(
        fcnn_aggregator(x2, w1, b1, w2, b2, alpha, block_b=256))
    ref2 = reference_forward(x2, w1, b1, w2, b2, alpha)
    assert out2.shape == (B2, output_dim)
    assert jnp.allclose(out2, ref2, atol=1e-5, rtol=1e-5), "ragged mismatch"

    print("KERNEL_OK")
</pallas_src>

<mosaic_0001>
module attributes {stable_mosaic.version = 11 : i64} {
  func.func @fcnn_aggregator_kernel(%arg0: i32, %arg1: memref<1x1xf32, #tpu.memory_space<smem>>, %arg2: memref<8x32xf32, #tpu.memory_space<vmem>>, %arg3: memref<32x128xf32, #tpu.memory_space<vmem>>, %arg4: memref<1x128xf32, #tpu.memory_space<vmem>>, %arg5: memref<128x64xf32, #tpu.memory_space<vmem>>, %arg6: memref<1x64xf32, #tpu.memory_space<vmem>>, %arg7: memref<8x64xf32, #tpu.memory_space<vmem>>) attributes {dimension_semantics = [#tpu.dimension_semantics<parallel>], iteration_bounds = array<i64: 1>, scalar_prefetch = 0 : i64, scratch_operands = 0 : i64, tpu.core_type = #tpu.core_type<tc>, window_params = [{transform_indices = @transform_0, window_bounds = array<i64: 1, 1>}, {transform_indices = @transform_1, window_bounds = array<i64: 8, 32>}, {pipeline_mode = #tpu.pipeline_mode<synchronous>, transform_indices = @transform_2, window_bounds = array<i64: 32, 128>}, {pipeline_mode = #tpu.pipeline_mode<synchronous>, transform_indices = @transform_3, window_bounds = array<i64: 1, 128>}, {pipeline_mode = #tpu.pipeline_mode<synchronous>, transform_indices = @transform_4, window_bounds = array<i64: 128, 64>}, {pipeline_mode = #tpu.pipeline_mode<synchronous>, transform_indices = @transform_5, window_bounds = array<i64: 1, 64>}, {transform_indices = @transform_6, window_bounds = array<i64: 8, 64>}]} {
    %c0 = arith.constant 0 : index
    %c0_0 = arith.constant 0 : index
    %0 = memref.load %arg1[%c0, %c0_0] : memref<1x1xf32, #tpu.memory_space<smem>>
    %c0_1 = arith.constant 0 : index
    %c0_2 = arith.constant 0 : index
    %1 = vector.load %arg2[%c0_1, %c0_2] : memref<8x32xf32, #tpu.memory_space<vmem>>, vector<8x32xf32>
    %c0_3 = arith.constant 0 : index
    %c0_4 = arith.constant 0 : index
    %2 = vector.load %arg3[%c0_3, %c0_4] : memref<32x128xf32, #tpu.memory_space<vmem>>, vector<32x128xf32>
    %cst = arith.constant dense<0.000000e+00> : vector<8x128xf32>
    %3 = tpu.matmul %1, %2, %cst {dimension_numbers = #tpu.dot_dimension_numbers<[1], [0], [0], [1], [0, 0, 1, 1], [], []>} : vector<8x32xf32>, vector<32x128xf32>, vector<8x128xf32> -> vector<8x128xf32>
    %c0_5 = arith.constant 0 : index
    %c0_6 = arith.constant 0 : index
    %4 = vector.load %arg4[%c0_5, %c0_6] : memref<1x128xf32, #tpu.memory_space<vmem>>, vector<1x128xf32>
    %5 = vector.broadcast %4 : vector<1x128xf32> to vector<8x128xf32>
    %6 = arith.addf %3, %5 : vector<8x128xf32>
    %cst_7 = arith.constant 0.000000e+00 : f32
    %7 = vector.broadcast %cst_7 : f32 to vector<8x128xf32>
    %8 = arith.cmpf ogt, %6, %7 : vector<8x128xf32>
    %9 = vector.broadcast %0 : f32 to vector<8x128xf32>
    %10 = arith.mulf %9, %6 : vector<8x128xf32>
    %11 = arith.select %8, %6, %10 : vector<8x128xi1>, vector<8x128xf32>
    %c0_8 = arith.constant 0 : index
    %c0_9 = arith.constant 0 : index
    %12 = vector.load %arg5[%c0_8, %c0_9] : memref<128x64xf32, #tpu.memory_space<vmem>>, vector<128x64xf32>
    %cst_10 = arith.constant dense<0.000000e+00> : vector<8x64xf32>
    %13 = tpu.matmul %11, %12, %cst_10 {dimension_numbers = #tpu.dot_dimension_numbers<[1], [0], [0], [1], [0, 0, 1, 1], [], []>} : vector<8x128xf32>, vector<128x64xf32>, vector<8x64xf32> -> vector<8x64xf32>
    %c0_11 = arith.constant 0 : index
    %c0_12 = arith.constant 0 : index
    %14 = vector.load %arg6[%c0_11, %c0_12] : memref<1x64xf32, #tpu.memory_space<vmem>>, vector<1x64xf32>
    %15 = vector.broadcast %14 : vector<1x64xf32> to vector<8x64xf32>
    %16 = arith.addf %13, %15 : vector<8x64xf32>
    %cst_13 = arith.constant 0.000000e+00 : f32
    %17 = vector.broadcast %cst_13 : f32 to vector<8x64xf32>
    %18 = arith.cmpf ogt, %16, %17 : vector<8x64xf32>
    %19 = vector.broadcast %0 : f32 to vector<8x64xf32>
    %20 = arith.mulf %19, %16 : vector<8x64xf32>
    %21 = arith.select %18, %16, %20 : vector<8x64xi1>, vector<8x64xf32>
    %c0_14 = arith.constant 0 : index
    %c0_15 = arith.constant 0 : index
    %22 = vector.load %arg7[%c0_14, %c0_15] : memref<8x64xf32, #tpu.memory_space<vmem>>, vector<8x64xf32>
    tpu.vector_store %arg7[%c0_14, %c0_15], %21 {strides = array<i32>} : memref<8x64xf32, #tpu.memory_space<vmem>>, vector<8x64xf32>,
    return
  }
  func.func @transform_0(%arg0: i32) -> (i32, i32) {
    %c0_i32 = arith.constant 0 : i32
    %c0_i32_0 = arith.constant 0 : i32
    %c0_i32_1 = arith.constant 0 : i32
    return %c0_i32, %c0_i32_0 : i32, i32
  }
  func.func @transform_1(%arg0: i32) -> (i32, i32) {
    %c0_i32 = arith.constant 0 : i32
    %c0_i32_0 = arith.constant 0 : i32
    return %arg0, %c0_i32 : i32, i32
  }
  func.func @transform_2(%arg0: i32) -> (i32, i32) {
    %c0_i32 = arith.constant 0 : i32
    %c0_i32_0 = arith.constant 0 : i32
    %c0_i32_1 = arith.constant 0 : i32
    return %c0_i32, %c0_i32_0 : i32, i32
  }
  func.func @transform_3(%arg0: i32) -> (i32, i32) {
    %c0_i32 = arith.constant 0 : i32
    %c0_i32_0 = arith.constant 0 : i32
    %c0_i32_1 = arith.constant 0 : i32
    return %c0_i32, %c0_i32_0 : i32, i32
  }
  func.func @transform_4(%arg0: i32) -> (i32, i32) {
    %c0_i32 = arith.constant 0 : i32
    %c0_i32_0 = arith.constant 0 : i32
    %c0_i32_1 = arith.constant 0 : i32
    return %c0_i32, %c0_i32_0 : i32, i32
  }
  func.func @transform_5(%arg0: i32) -> (i32, i32) {
    %c0_i32 = arith.constant 0 : i32
    %c0_i32_0 = arith.constant 0 : i32
    %c0_i32_1 = arith.constant 0 : i32
    return %c0_i32, %c0_i32_0 : i32, i32
  }
  func.func @transform_6(%arg0: i32) -> (i32, i32) {
    %c0_i32 = arith.constant 0 : i32
    %c0_i32_0 = arith.constant 0 : i32
    return %arg0, %c0_i32 : i32, i32
  }
}

</mosaic_0001>

<bundles_post_ra>
// kernel: tpu_custom_call.1
= control target key start
LH: loop header
LB: loop body
LE: loop exit
PB: predicated region body
PF: predicated region fallthrough
CT: control target
= control target key end

     0   :  { %v357_v3 = vmov 0.0|0.0   ;;  %vm358_vm0 = vmmov 0   ;;  %v359_v6 = vmov 0.0   ;;  %s480_s0 = inlined_call_operand.<no memory space> [shape: f32[1,1], index: 0, kind: input, shape index: {}]   ;;  %s481_s1 = inlined_call_operand.vmem [shape: f32[8,32], index: 1, kind: input, shape index: {}]   ;;  %s482_s2 = inlined_call_operand.vmem [shape: f32[32,128], index: 2, kind: input, shape index: {}]   ;;  %s483_s3 = inlined_call_operand.vmem [shape: f32[1,128], index: 3, kind: input, shape index: {}]   ;;  %s484_s4 = inlined_call_operand.vmem [shape: f32[128,64], index: 4, kind: input, shape index: {}]   ;;  %s485_s5 = inlined_call_operand.vmem [shape: f32[1,64], index: 5, kind: input, shape index: {}]   ;;  %s486_s6 = inlined_call_operand.hbm [shape: f32[8,64], index: 6, kind: output, shape index: {}]  }
   0x1   :  { %v27_v0 = vld [vmem:[%s482_s2] sm:$0xff]  ;;  %v28_v1 = vld [vmem:[%s482_s2 + $0x8] sm:$0xff]  ;;  %v29_v2 = vld [vmem:[%s482_s2 + $0x10] sm:$0xff]  ;;  %299 = vmatprep.subr.bf16.mxu0 %v357_v3  ;;  %261 = vmatprep.mubr.msk.f32.mxu0 %vm358_vm0, %v359_v6 }
   0x2   :  { %v300_v4 = vpack.c.bf16 %v28_v1, %v27_v0  ;;  %v30_v5 = vld [vmem:[%s482_s2 + $0x18] sm:$0xff]  ;;  %v116_v7 = vld [vmem:[%s484_s4] sm:$0xff]  ;;  %305 = vmatprep.subr.bf16.mxu1 %v357_v3  ;;  %v117_v8 = vld [vmem:[%s484_s4 + $0x8] sm:$0xff]  ;;  %296 = vmatprep.mubr.msk.f32.mxu1 %vm358_vm0, %v359_v6 }
   0x3   :  { %v118_v9 = vld [vmem:[%s484_s4 + $0x10] sm:$0xff]  ;;  %v119_v10 = vld [vmem:[%s484_s4 + $0x18] sm:$0xff]  ;;  %v303_v11 = vpack.c.bf16 %v30_v5, %v29_v2  ;;  %v306_v12 = vpack.c.bf16 %v117_v8, %v116_v7  ;;  %v120_v14 = vld [vmem:[%s484_s4 + $0x20] sm:$0xff] }
   0x4   :  { %301 = vmatpush3.bf16.msra.mxu0 %v300_v4  ;;  %v309_v13 = vpack.c.bf16 %v119_v10, %v118_v9  ;;  %v121_v15 = vld [vmem:[%s484_s4 + $0x28] sm:$0xff] }
   0x5   :  { %302 = vmatprep.subr.bf16.mxu0 %v357_v3  ;;  %307 = vmatpush3.bf16.msra.mxu1 %v306_v12 }
   0x6   :  { %308 = vmatprep.subr.bf16.mxu1 %v357_v3 }
   0x7   :  { %12 = vsyncpa [#allocation4], 0  ;;  %v26_v16 = vld [vmem:[%s481_s1] sm:$0xff]  ;;  %vm38_vm1 = vcmask 261120   ;;  %v312_v17 = vpack.c.bf16 %v121_v15, %v120_v14  ;;  %v122_v18 = vld [vmem:[%s484_s4 + $0x30] sm:$0xff]  ;;  %v113_v35 = vstv %s480_s0  ;;  %vm212_vm4 = vcmask 523264  }
   0x8   :  { %304 = vmatpush3.bf16.msra.mxu0 %v303_v11  ;;  %v123_v19 = vld [vmem:[%s484_s4 + $0x38] sm:$0xff]  ;;  %v124_v21 = vld [vmem:[%s484_s4 + $0x40] sm:$0xff]  ;;  %v125_v22 = vld [vmem:[%s484_s4 + $0x48] sm:$0xff] }
   0x9   :  { %310 = vmatpush3.bf16.msra.mxu1 %v309_v13  ;;  %v315_v20 = vpack.c.bf16 %v123_v19, %v122_v18  ;;  %v318_v23 = vpack.c.bf16 %v125_v22, %v124_v21  ;;  %v126_v24 = vld [vmem:[%s484_s4 + $0x50] sm:$0xff]  ;;  %v127_v25 = vld [vmem:[%s484_s4 + $0x58] sm:$0xff]  ;;  %v128_v27 = vld [vmem:[%s484_s4 + $0x60] sm:$0xff] }
   0xa   :  { %311 = vmatprep.subr.bf16.mxu1 %v357_v3  ;;  %v321_v26 = vpack.c.bf16 %v127_v25, %v126_v24  ;;  %v129_v28 = vld [vmem:[%s484_s4 + $0x68] sm:$0xff]  ;;  %v130_v30 = vld [vmem:[%s484_s4 + $0x70] sm:$0xff]  ;;  %v131_v31 = vld [vmem:[%s484_s4 + $0x78] sm:$0xff]  ;;  %s360_s4 = smov [#allocation3]  }
   0xb   :  { %262 = vmatmul.mubr.msk.f32.vlgmr.msra.gmra.mrb[0].mxu0 %vm38_vm1, %v26_v16  ;;  %v324_v29 = vpack.c.bf16 %v129_v28, %v128_v27  ;;  %v327_v32 = vpack.c.bf16 %v131_v31, %v130_v30  ;;  %v228_v33 = vld [vmem:[%s483_s3] ss:$0 sm:$0xff]  ;;  %s220_s3 = sshll.u32 %s360_s4, 4  ;;  %s221_s3 = int_to_ptr.vmem [resolvable:$true] %s220_s3 }
   0xc   :  { %v230_v40 = vld [vmem:[%s485_s5] ss:$0 sm:$0xff]  ;;  %s333_s0 = scalar_lea.vmem %s221_s3, 128  ;;  %p338_p1 = scmp.lt.s32.totalorder %s221_s3, %s221_s3 }
   0xd   :  { %313 = vmatpush3.bf16.msra.mxu1 %v312_v17  ;;  %p334_p0 = scmp.ne.s32.totalorder %s221_s3, %s333_s0  ;;  %p339_p2 = scmp.lt.s32.totalorder %s333_s0, %s333_s0 }
   0xe   :  { %314 = vmatprep.subr.bf16.mxu1 %v357_v3 }
   0xf   :  { %p340_p3 = por %p339_p2, %p338_p1 }
  0x11   :  { %316 = vmatpush3.bf16.msra.mxu1 %v315_v20  ;;  %p341_p4 = pnand %p340_p3, %p334_p0 }
  0x12   :  { %317 = vmatprep.subr.bf16.mxu1 %v357_v3 }
  0x15   :  { %319 = vmatpush3.bf16.msra.mxu1 %v318_v23 }
  0x16   :  { %320 = vmatprep.subr.bf16.mxu1 %v357_v3 }
  0x19   :  { %322 = vmatpush3.bf16.msra.mxu1 %v321_v26 }
  0x1a   :  { %323 = vmatprep.subr.bf16.mxu1 %v357_v3 }
  0x1d   :  { %325 = vmatpush3.bf16.msra.mxu1 %v324_v29 }
  0x1e   :  { %326 = vmatprep.subr.bf16.mxu1 %v357_v3 }
  0x21   :  { %328 = vmatpush3.bf16.msra.mxu1 %v327_v32 }
  0xde   :  { %v108_v34 = vpop.f32.mrb[0].mxu0 }
  0xdf   :  { %v109_v36 = vadd.f32 %v228_v33, %v108_v34  ;;  %v263_v37 = vpop.f32.mrb[1].mxu0 }
  0xe1   :  { %v114_v38 = vmul.f32 %v113_v35, %v109_v36  ;;  %vm112_vm2 = vcmp.gt.f32.partialorder %v109_v36, 0.0 }
  0xe3   :  { %v115_v39 = vsel %vm112_vm2, %v109_v36, %v114_v38 }
  0xe4   :  { %297 = vmatmul.mubr.f32.vlgmr.msra.gmra.mrb[0].mxu1 %v115_v39 }
 0x1b7   :  { %v205_v41 = vpop.f32.mrb[0].mxu1 }
 0x1b8   :  { %v206_v42 = vadd.f32 %v230_v40, %v205_v41  ;;  %v298_v43 = vpop.f32.mrb[1].mxu1 }
 0x1ba   :  { %v210_v44 = vmul.f32 %v206_v42, %v113_v35  ;;  %vm209_vm3 = vcmp.gt.f32.partialorder %v206_v42, 0.0 }
 0x1bc   :  { %v211_v45 = vsel %vm209_vm3, %v206_v42, %v210_v44 }
 0x1bd   :  { %213 = vst.msk [vmem:[#allocation3] sm:$0xff] %vm212_vm4, %v211_v45 }
 0x1be   :  { %344 = shalt.err (!%p341_p4)
}
 0x1bf   :  { %s345_s19 = scalar_lea.hbm %s486_s6, 128 }
 0x1c0   :  { %p346_p5 = scmp.ne.s32.totalorder %s486_s6, %s345_s19  ;;  %p349_p6 = scmp.lt.u32.totalorder %s345_s19, %s486_s6 }
 0x1c2   :  { %p351_p7 = pnand %p349_p6, %p346_p5 }
 0x1c4   :  { %354 = shalt.err (!%p351_p7)
}
 0x1c5   :  { %223 = dma.vmem_to_hbm [thread:$0]  %s221_s3, 128, %s486_s6, [#allocation4]  }
 0x1c6   :  { %355 = dma.done.wait [#allocation4], 128  }
 0x1c7   :  { %356 = vsyncadd [#allocation4], 4294967168 }
 0x1c8   :  { %227 = vsyncpa [#allocation4], 1 }

</bundles_post_ra>
